<compile_context>
chip_gen: v7x
topology: tpu7x:2x2x1
jax: 0.10.0
libtpu: 0.0.40
codegen_flags: <defaults>
</compile_context>

<pallas_src>
import jax
import jax.numpy as jnp
from jax.experimental import pallas as pl
from jax.experimental.pallas import tpu as pltpu


def _round_up(x, m):
    return (x + m - 1) // m * m


def _choose_batch_tile(b, batch_tile):
    """Pick a batch tile: large, 128-aligned when possible, >=2 grid steps
    when the batch allows (v7x two-TC sharding), multiple of 8 always."""
    b8 = _round_up(b, 8)
    tb = min(batch_tile, b8)
    if b8 >= 16:                                   # allow >=2 grid steps
        tb = min(tb, _round_up((b8 + 1) // 2, 8))
    if tb >= 128:
        tb = (tb // 128) * 128                     # MXU/M-friendly
    else:
        tb = _round_up(tb, 8)
    return tb


def _decoder_kernel(emb_ref, w1_ref, b1_ref, w2_ref, b2_ref, out_ref):
    """Fused two-head MLP: [TB,E]@[E,Hp] matmul, lane-dense f32 bias+ReLU,
    [TB,Hp]@[Hp,Op] block-diagonal matmul, lane-dense store in out dtype."""
    x = emb_ref[...].astype(w1_ref.dtype)                              # cast in-kernel
    h = jnp.dot(x, w1_ref[...], preferred_element_type=jnp.float32)    # [TB, Hp] f32
    h = jnp.maximum(h + b1_ref[...], 0.0)                              # f32 epilogue
    h = h.astype(w2_ref.dtype)                                         # back to MXU dtype
    y = jnp.dot(h, w2_ref[...], preferred_element_type=jnp.float32)    # [TB, Op] f32
    out_ref[...] = (y + b2_ref[...]).astype(out_ref.dtype)


def fuse_decoder_params(params, embedding_dim, num_node, num_features, *,
                        param_dtype=jnp.bfloat16):
    """One-time fusion/padding/cast of the two heads' parameters.

    Call this ONCE per parameter set; `decoder_forward` streams only these
    fused tensors (no per-call concatenation / padding / casting)."""
    e = embedding_dim
    nn_out = num_node * num_node
    nf_out = num_node * num_features
    out_dim = nn_out + nf_out
    out_pad = _round_up(out_dim, 128)   # lane-dense output slab
    h_pad = _round_up(2 * e, 128)       # lane-dense hidden

    # First layer: concat the two heads, zero-pad hidden columns.
    w1 = jnp.zeros((e, h_pad), jnp.float32)
    w1 = w1.at[:, :e].set(params["adj_w1"])
    w1 = w1.at[:, e:2 * e].set(params["ops_w1"])
    b1 = jnp.zeros((1, h_pad), jnp.float32)          # pad entries stay 0
    b1 = b1.at[0, :e].set(params["adj_b1"])
    b1 = b1.at[0, e:2 * e].set(params["ops_b1"])

    # Second layer: block-diagonal; zero pad rows/cols contribute exactly 0.
    w2 = jnp.zeros((h_pad, out_pad), jnp.float32)
    w2 = w2.at[:e, :nn_out].set(params["adj_w2"])
    w2 = w2.at[e:2 * e, nn_out:out_dim].set(params["ops_w2"])
    b2 = jnp.zeros((1, out_pad), jnp.float32)
    b2 = b2.at[0, :nn_out].set(params["adj_b2"])
    b2 = b2.at[0, nn_out:out_dim].set(params["ops_b2"])

    return dict(
        w1=w1.astype(param_dtype),      # bf16 storage halves weight HBM bytes
        b1=b1,                          # biases stay f32 (f32 VPU epilogue)
        w2=w2.astype(param_dtype),
        b2=b2,
        param_dtype=param_dtype,
        embedding_dim=e,
        nn_out=nn_out, nf_out=nf_out,
        out_dim=out_dim, out_pad=out_pad, h_pad=h_pad,
    )


def decoder_forward(embedding, fused, num_node, num_features, *,
                    batch_tile=512):
    """Decoder forward via a single fused Pallas kernel.

    embedding: [B, E] float32 (passed to the kernel as-is; cast in-kernel)
    fused:     output of `fuse_decoder_params`
    returns:   (adj [B, N, N], ops [B, N, F]) in fused['param_dtype']
    """
    b, e = embedding.shape
    assert e == fused["embedding_dim"]
    h_pad = fused["h_pad"]
    out_pad = fused["out_pad"]
    nn_out = fused["nn_out"]
    out_dim = fused["out_dim"]
    out_dtype = fused["param_dtype"]

    tb = _choose_batch_tile(b, batch_tile)
    b_pad = _round_up(b, tb)
    emb = embedding
    if b_pad != b:
        emb = jnp.pad(emb, ((0, b_pad - b), (0, 0)))

    grid = (b_pad // tb,)

    flops = 2 * b_pad * (e * h_pad + h_pad * out_pad)
    bytes_accessed = (
        emb.size * emb.dtype.itemsize
        + fused["w1"].size * fused["w1"].dtype.itemsize
        + fused["w2"].size * fused["w2"].dtype.itemsize
        + (fused["b1"].size + fused["b2"].size) * 4
        + b_pad * out_pad * jnp.dtype(out_dtype).itemsize
    )

    out = pl.pallas_call(
        _decoder_kernel,
        out_shape=jax.ShapeDtypeStruct((b_pad, out_pad), out_dtype),
        grid=grid,
        in_specs=[
            # activations: tiled over the batch grid (pipelined)
            pl.BlockSpec((tb, e), lambda i: (i, 0)),
            # weights / biases: constant index_map -> VMEM-resident
            pl.BlockSpec((e, h_pad), lambda i: (0, 0)),
            pl.BlockSpec((1, h_pad), lambda i: (0, 0)),
            pl.BlockSpec((h_pad, out_pad), lambda i: (0, 0)),
            pl.BlockSpec((1, out_pad), lambda i: (0, 0)),
        ],
        out_specs=pl.BlockSpec((tb, out_pad), lambda i: (i, 0)),
        compiler_params=pltpu.CompilerParams(
            dimension_semantics=("parallel",),
        ),
        cost_estimate=pl.CostEstimate(
            flops=flops, transcendentals=0, bytes_accessed=bytes_accessed),
    )(emb, fused["w1"], fused["b1"], fused["w2"], fused["b2"])

    # Boundary glue to return the module's (adj, ops) shapes.
    adj = out[:b, :nn_out].reshape(b, num_node, num_node)
    ops = out[:b, nn_out:out_dim].reshape(b, num_node, num_features)
    return adj, ops


def init_decoder_params(key, embedding_dim, num_node, num_features):
    """Deterministic parameter init (uniform, PyTorch-Linear-style bounds).

    Weights are stored [in_features, out_features] (transposed vs torch)."""
    e = embedding_dim
    nn_out = num_node * num_node
    nf_out = num_node * num_features
    keys = jax.random.split(key, 8)

    def lin(kw, kb, fan_in, fan_out):
        bound = 1.0 / jnp.sqrt(jnp.float32(fan_in))
        w = jax.random.uniform(kw, (fan_in, fan_out), jnp.float32, -bound, bound)
        bias = jax.random.uniform(kb, (fan_out,), jnp.float32, -bound, bound)
        return w, bias

    adj_w1, adj_b1 = lin(keys[0], keys[1], e, e)
    adj_w2, adj_b2 = lin(keys[2], keys[3], e, nn_out)
    ops_w1, ops_b1 = lin(keys[4], keys[5], e, e)
    ops_w2, ops_b2 = lin(keys[6], keys[7], e, nf_out)
    return dict(
        adj_w1=adj_w1, adj_b1=adj_b1, adj_w2=adj_w2, adj_b2=adj_b2,
        ops_w1=ops_w1, ops_b1=ops_b1, ops_w2=ops_w2, ops_b2=ops_b2,
    )


def decoder_reference(embedding, params, num_node, num_features,
                      param_dtype=jnp.float32):
    """Pure-JAX reference of the PyTorch forward; `param_dtype` emulates the
    same storage/output rounding the kernel applies (f32 = exact torch)."""
    def q(a):
        return a.astype(param_dtype).astype(jnp.float32)

    b = embedding.shape[0]
    x = q(embedding)
    h = jnp.maximum(x @ q(params["adj_w1"]) + params["adj_b1"], 0.0)
    adj = (q(h) @ q(params["adj_w2"]) + params["adj_b2"]).astype(param_dtype)
    h = jnp.maximum(x @ q(params["ops_w1"]) + params["ops_b1"], 0.0)
    ops = (q(h) @ q(params["ops_w2"]) + params["ops_b2"]).astype(param_dtype)
    return (adj.astype(jnp.float32).reshape(b, num_node, num_node),
            ops.astype(jnp.float32).reshape(b, num_node, num_features))


if __name__ == "__main__":
    embedding_dim = 32
    num_node = 8
    num_features = 4

    key = jax.random.PRNGKey(0)
    k_params, k1, k2, k3 = jax.random.split(key, 4)
    params = init_decoder_params(k_params, embedding_dim, num_node, num_features)

    # Fuse / pad / cast the weights ONCE (not per forward call).
    fused_bf16 = fuse_decoder_params(params, embedding_dim, num_node,
                                     num_features, param_dtype=jnp.bfloat16)
    fused_f32 = fuse_decoder_params(params, embedding_dim, num_node,
                                    num_features, param_dtype=jnp.float32)

    # --- test 1: tiny batch, bf16 production path ---
    batch1 = 2
    emb1 = jax.random.normal(k1, (batch1, embedding_dim), jnp.float32)
    adj1, ops1 = decoder_forward(emb1, fused_bf16, num_node, num_features)
    adj1 = jax.block_until_ready(adj1)
    ops1 = jax.block_until_ready(ops1)
    adj1_ref, ops1_ref = decoder_reference(emb1, params, num_node, num_features,
                                           param_dtype=jnp.bfloat16)
    assert adj1.shape == (batch1, num_node, num_node)
    assert ops1.shape == (batch1, num_node, num_features)
    assert jnp.allclose(adj1.astype(jnp.float32), adj1_ref, atol=2e-2, rtol=2e-2)
    assert jnp.allclose(ops1.astype(jnp.float32), ops1_ref, atol=2e-2, rtol=2e-2)

    # --- test 2: ragged batch exercising grid>1 + batch padding, f32 exact ---
    batch2 = 20
    emb2 = jax.random.normal(k2, (batch2, embedding_dim), jnp.float32)
    adj2, ops2 = decoder_forward(emb2, fused_f32, num_node, num_features,
                                 batch_tile=8)
    adj2 = jax.block_until_ready(adj2)
    ops2 = jax.block_until_ready(ops2)
    adj2_ref, ops2_ref = decoder_reference(emb2, params, num_node, num_features,
                                           param_dtype=jnp.float32)
    assert adj2.shape == (batch2, num_node, num_node)
    assert ops2.shape == (batch2, num_node, num_features)
    assert jnp.allclose(adj2.astype(jnp.float32), adj2_ref, atol=1e-5, rtol=1e-5)
    assert jnp.allclose(ops2.astype(jnp.float32), ops2_ref, atol=1e-5, rtol=1e-5)

    # --- test 3: 128-aligned tiles and >=2 grid steps, bf16 ---
    batch3 = 256
    emb3 = jax.random.normal(k3, (batch3, embedding_dim), jnp.float32)
    adj3, ops3 = decoder_forward(emb3, fused_bf16, num_node, num_features)
    adj3 = jax.block_until_ready(adj3)
    ops3 = jax.block_until_ready(ops3)
    adj3_ref, ops3_ref = decoder_reference(emb3, params, num_node, num_features,
                                           param_dtype=jnp.bfloat16)
    assert jnp.allclose(adj3.astype(jnp.float32), adj3_ref, atol=2e-2, rtol=2e-2)
    assert jnp.allclose(ops3.astype(jnp.float32), ops3_ref, atol=2e-2, rtol=2e-2)

    print("KERNEL_OK")
</pallas_src>

<mosaic_0001>
module attributes {stable_mosaic.version = 11 : i64} {
  func.func @_decoder_kernel(%arg0: i32, %arg1: memref<8x32xf32, #tpu.memory_space<vmem>>, %arg2: memref<32x128xbf16, #tpu.memory_space<vmem>>, %arg3: memref<1x128xf32, #tpu.memory_space<vmem>>, %arg4: memref<128x128xbf16, #tpu.memory_space<vmem>>, %arg5: memref<1x128xf32, #tpu.memory_space<vmem>>, %arg6: memref<8x128xbf16, #tpu.memory_space<vmem>>) attributes {dimension_semantics = [#tpu.dimension_semantics<parallel>], iteration_bounds = array<i64: 1>, scalar_prefetch = 0 : i64, scratch_operands = 0 : i64, tpu.core_type = #tpu.core_type<tc>, window_params = [{transform_indices = @transform_0, window_bounds = array<i64: 8, 32>}, {pipeline_mode = #tpu.pipeline_mode<synchronous>, transform_indices = @transform_1, window_bounds = array<i64: 32, 128>}, {pipeline_mode = #tpu.pipeline_mode<synchronous>, transform_indices = @transform_2, window_bounds = array<i64: 1, 128>}, {pipeline_mode = #tpu.pipeline_mode<synchronous>, transform_indices = @transform_3, window_bounds = array<i64: 128, 128>}, {pipeline_mode = #tpu.pipeline_mode<synchronous>, transform_indices = @transform_4, window_bounds = array<i64: 1, 128>}, {transform_indices = @transform_5, window_bounds = array<i64: 8, 128>}]} {
    %c0 = arith.constant 0 : index
    %c0_0 = arith.constant 0 : index
    %0 = vector.load %arg1[%c0, %c0_0] : memref<8x32xf32, #tpu.memory_space<vmem>>, vector<8x32xf32>
    %1 = arith.truncf %0 : vector<8x32xf32> to vector<8x32xbf16>
    %c0_1 = arith.constant 0 : index
    %c0_2 = arith.constant 0 : index
    %2 = vector.load %arg2[%c0_1, %c0_2] : memref<32x128xbf16, #tpu.memory_space<vmem>>, vector<32x128xbf16>
    %cst = arith.constant dense<0.000000e+00> : vector<8x128xf32>
    %3 = tpu.matmul %1, %2, %cst {dimension_numbers = #tpu.dot_dimension_numbers<[1], [0], [0], [1], [0, 0, 1, 1], [], []>} : vector<8x32xbf16>, vector<32x128xbf16>, vector<8x128xf32> -> vector<8x128xf32>
    %c0_3 = arith.constant 0 : index
    %c0_4 = arith.constant 0 : index
    %4 = vector.load %arg3[%c0_3, %c0_4] : memref<1x128xf32, #tpu.memory_space<vmem>>, vector<1x128xf32>
    %5 = vector.broadcast %4 : vector<1x128xf32> to vector<8x128xf32>
    %6 = arith.addf %3, %5 : vector<8x128xf32>
    %cst_5 = arith.constant 0.000000e+00 : f32
    %7 = vector.broadcast %cst_5 : f32 to vector<8x128xf32>
    %8 = arith.maximumf %6, %7 : vector<8x128xf32>
    %9 = arith.truncf %8 : vector<8x128xf32> to vector<8x128xbf16>
    %c0_6 = arith.constant 0 : index
    %c0_7 = arith.constant 0 : index
    %10 = vector.load %arg4[%c0_6, %c0_7] : memref<128x128xbf16, #tpu.memory_space<vmem>>, vector<128x128xbf16>
    %cst_8 = arith.constant dense<0.000000e+00> : vector<8x128xf32>
    %11 = tpu.matmul %9, %10, %cst_8 {dimension_numbers = #tpu.dot_dimension_numbers<[1], [0], [0], [1], [0, 0, 1, 1], [], []>} : vector<8x128xbf16>, vector<128x128xbf16>, vector<8x128xf32> -> vector<8x128xf32>
    %c0_9 = arith.constant 0 : index
    %c0_10 = arith.constant 0 : index
    %12 = vector.load %arg5[%c0_9, %c0_10] : memref<1x128xf32, #tpu.memory_space<vmem>>, vector<1x128xf32>
    %13 = vector.broadcast %12 : vector<1x128xf32> to vector<8x128xf32>
    %14 = arith.addf %11, %13 : vector<8x128xf32>
    %15 = arith.truncf %14 : vector<8x128xf32> to vector<8x128xbf16>
    %c0_11 = arith.constant 0 : index
    %c0_12 = arith.constant 0 : index
    %16 = vector.load %arg6[%c0_11, %c0_12] : memref<8x128xbf16, #tpu.memory_space<vmem>>, vector<8x128xbf16>
    tpu.vector_store %arg6[%c0_11, %c0_12], %15 {strides = array<i32>} : memref<8x128xbf16, #tpu.memory_space<vmem>>, vector<8x128xbf16>,
    return
  }
  func.func @transform_0(%arg0: i32) -> (i32, i32) {
    %c0_i32 = arith.constant 0 : i32
    %c0_i32_0 = arith.constant 0 : i32
    return %arg0, %c0_i32 : i32, i32
  }
  func.func @transform_1(%arg0: i32) -> (i32, i32) {
    %c0_i32 = arith.constant 0 : i32
    %c0_i32_0 = arith.constant 0 : i32
    %c0_i32_1 = arith.constant 0 : i32
    return %c0_i32, %c0_i32_0 : i32, i32
  }
  func.func @transform_2(%arg0: i32) -> (i32, i32) {
    %c0_i32 = arith.constant 0 : i32
    %c0_i32_0 = arith.constant 0 : i32
    %c0_i32_1 = arith.constant 0 : i32
    return %c0_i32, %c0_i32_0 : i32, i32
  }
  func.func @transform_3(%arg0: i32) -> (i32, i32) {
    %c0_i32 = arith.constant 0 : i32
    %c0_i32_0 = arith.constant 0 : i32
    %c0_i32_1 = arith.constant 0 : i32
    return %c0_i32, %c0_i32_0 : i32, i32
  }
  func.func @transform_4(%arg0: i32) -> (i32, i32) {
    %c0_i32 = arith.constant 0 : i32
    %c0_i32_0 = arith.constant 0 : i32
    %c0_i32_1 = arith.constant 0 : i32
    return %c0_i32, %c0_i32_0 : i32, i32
  }
  func.func @transform_5(%arg0: i32) -> (i32, i32) {
    %c0_i32 = arith.constant 0 : i32
    %c0_i32_0 = arith.constant 0 : i32
    return %arg0, %c0_i32 : i32, i32
  }
}

</mosaic_0001>

<bundles_post_ra>
// kernel: tpu_custom_call.1
= control target key start
LH: loop header
LB: loop body
LE: loop exit
PB: predicated region body
PF: predicated region fallthrough
CT: control target
= control target key end

     0   :  { %10 = vsyncpa [#allocation3], 0  ;;  %s524_s0 = inlined_call_operand.hbm [shape: f32[8,32], index: 0, kind: input, shape index: {}]   ;;  %s525_s1 = inlined_call_operand.hbm [shape: bf16[32,128], index: 1, kind: input, shape index: {}]   ;;  %s526_s2 = inlined_call_operand.vmem [shape: f32[1,128], index: 2, kind: input, shape index: {}]   ;;  %s527_s3 = inlined_call_operand.hbm [shape: bf16[128,128], index: 3, kind: input, shape index: {}]   ;;  %s528_s4 = inlined_call_operand.vmem [shape: f32[1,128], index: 4, kind: input, shape index: {}]   ;;  %s529_s5 = inlined_call_operand.hbm [shape: bf16[8,128], index: 5, kind: output, shape index: {}]  }
   0x1   :  { %11 = vsyncpa [#allocation6], 0 }
   0x2   :  { %12 = vsyncpa [#allocation4], 0  ;;  %s426_s18 = smov [#allocation5]   ;;  %s332_s22 = scalar_lea.hbm %s525_s1, 256 }
   0x3   :  { %s28_s19 = sshll.u32 %s426_s18, 4  ;;  %p333_p0 = scmp.ne.s32.totalorder %s525_s1, %s332_s22  ;;  %s29_s19 = int_to_ptr.vmem [resolvable:$true] %s28_s19 }
   0x4   :  { %p336_p1 = scmp.lt.u32.totalorder %s332_s22, %s525_s1 }
   0x6   :  { %p338_p2 = pnand %p336_p1, %p333_p0 }
   0x8   :  { %341 = shalt.err (!%p338_p2)
}
   0x9   :  { %s342_s27 = scalar_lea.vmem %s29_s19, 256  ;;  %p347_p4 = scmp.lt.s32.totalorder %s29_s19, %s29_s19 }
   0xa   :  { %p343_p3 = scmp.ne.s32.totalorder %s29_s19, %s342_s27  ;;  %p348_p5 = scmp.lt.s32.totalorder %s342_s27, %s342_s27 }
   0xc   :  { %p349_p6 = por %p348_p5, %p347_p4 }
   0xe   :  { %p350_p7 = pnand %p349_p6, %p343_p3 }
  0x10   :  { %353 = shalt.err (!%p350_p7)
}
  0x11   :  { %s427_s28 = smov 64   ;;  %s428_s29 = smov 4  }
  0x12   :  { %34 = dma.hbm_to_vmem [thread:$0]  %s525_s1, 256, %s29_s19, [#allocation6], %s427_s28, %s427_s28, %s428_s29  }
  0x13   :  { %s429_s7 = smov [#allocation2]   ;;  %s430_s9 = smov [#allocation7]  }
  0x14   :  { %s19_s8 = sshll.u32 %s429_s7, 4  ;;  %s42_s10 = sshll.u32 %s430_s9, 4  ;;  %s20_s8 = int_to_ptr.vmem [resolvable:$true] %s19_s8  ;;  %s43_s10 = int_to_ptr.vmem [resolvable:$true] %s42_s10 }
  0x15   :  { %s354_s13 = scalar_lea.hbm %s524_s0, 128 }
  0x16   :  { %p355_p8 = scmp.ne.s32.totalorder %s524_s0, %s354_s13  ;;  %p358_p9 = scmp.lt.u32.totalorder %s354_s13, %s524_s0 }
  0x18   :  { %p360_p10 = pnand %p358_p9, %p355_p8 }
  0x1a   :  { %363 = shalt.err (!%p360_p10)
}
  0x1b   :  { %s364_s1 = scalar_lea.vmem %s20_s8, 128  ;;  %p369_p12 = scmp.lt.s32.totalorder %s20_s8, %s20_s8 }
  0x1c   :  { %p365_p11 = scmp.ne.s32.totalorder %s20_s8, %s364_s1  ;;  %p370_p13 = scmp.lt.s32.totalorder %s364_s1, %s364_s1 }
  0x1e   :  { %p371_p0 = por %p370_p13, %p369_p12 }
  0x20   :  { %p372_p1 = pnand %p371_p0, %p365_p11 }
  0x22   :  { %375 = shalt.err (!%p372_p1)
}
  0x23   :  { %22 = dma.hbm_to_vmem [thread:$0]  %s524_s0, 128, %s20_s8, [#allocation3]  }
  0x24   :  { %s376_s22 = scalar_lea.hbm %s527_s3, 1024 }
  0x25   :  { %p377_p2 = scmp.ne.s32.totalorder %s527_s3, %s376_s22  ;;  %p380_p3 = scmp.lt.u32.totalorder %s376_s22, %s527_s3 }
  0x27   :  { %p382_p4 = pnand %p380_p3, %p377_p2 }
  0x29   :  { %385 = shalt.err (!%p382_p4)
}
  0x2a   :  { %s386_s27 = scalar_lea.vmem %s43_s10, 1024  ;;  %p391_p6 = scmp.lt.s32.totalorder %s43_s10, %s43_s10 }
  0x2b   :  { %p387_p5 = scmp.ne.s32.totalorder %s43_s10, %s386_s27  ;;  %p392_p7 = scmp.lt.s32.totalorder %s386_s27, %s386_s27 }
  0x2d   :  { %p393_p8 = por %p392_p7, %p391_p6 }
  0x2f   :  { %p394_p9 = pnand %p393_p8, %p387_p5 }
  0x31   :  { %397 = shalt.err (!%p394_p9)
}
  0x32   :  { %48 = dma.hbm_to_vmem [thread:$0]  %s527_s3, 1024, %s43_s10, [#allocation6], %s427_s28, %s427_s28, %s428_s29  }
  0x33   :  { %420 = dma.done.wait [#allocation3], 128  }
  0x34   :  { %421 = vsyncadd [#allocation3], 4294967168 }
  0x35   :  { %422 = dma.done.wait [#allocation6], 1280  }
  0x36   :  { %423 = vsyncadd [#allocation6], 4294966016  ;;  %v431_v0 = vmov 0.0   ;;  %vm432_vm0 = vmmov 0   ;;  %v322_v1 = vld [vmem:[#allocation5] sm:$0xff]   ;;  %v323_v2 = vld [vmem:[#allocation5 + $0x8] sm:$0xff]  }
  0x37   :  { %286 = vmatprep.subr.bf16.mxu0 %v431_v0  ;;  %290 = vmatprep.mubr.msk.bf16.mxu0 %vm432_vm0, %v431_v0  ;;  %v61_v3 = vld [vmem:[#allocation2] sm:$0xff]  ;;  %v324_v4 = vld [vmem:[#allocation7] sm:$0xff]   ;;  %vm86_vm1 = vcmask 261120   ;;  %v326_v7 = vld [vmem:[#allocation7 + $0x10] sm:$0xff]   ;;  %s433_s7 = smov [#allocation8]  }
  0x38   :  { %294 = vmatprep.subr.bf16.mxu1 %v431_v0  ;;  %310 = vmatprep.mubr.msk.bf16.mxu1 %vm432_vm0, %v431_v0  ;;  %v62_v5 = vpack.c.bf16 %v61_v3, %v61_v3  ;;  %v325_v6 = vld [vmem:[#allocation7 + $0x8] sm:$0xff]   ;;  %v327_v8 = vld [vmem:[#allocation7 + $0x18] sm:$0xff]   ;;  %v328_v9 = vld [vmem:[#allocation7 + $0x20] sm:$0xff]   ;;  %s251_s8 = sshll.u32 %s433_s7, 4  ;;  %s252_s8 = int_to_ptr.vmem [resolvable:$true] %s251_s8 }
  0x39   :  { %287 = vmatpush3.bf16.msra.mxu0 %v322_v1  ;;  %295 = vmatpush3.bf16.msra.mxu1 %v324_v4  ;;  %v329_v10 = vld [vmem:[#allocation7 + $0x28] sm:$0xff]   ;;  %v330_v11 = vld [vmem:[#allocation7 + $0x30] sm:$0xff]   ;;  %v331_v12 = vld [vmem:[#allocation7 + $0x38] sm:$0xff]   ;;  %p403_p11 = scmp.lt.s32.totalorder %s252_s8, %s252_s8 }
  0x3a   :  { %288 = vmatprep.subr.bf16.mxu0 %v431_v0  ;;  %296 = vmatprep.subr.bf16.mxu1 %v431_v0  ;;  %v261_v13 = vld [vmem:[%s526_s2] ss:$0 sm:$0xff]  ;;  %s398_s2 = scalar_lea.vmem %s252_s8, 64 }
  0x3b   :  { %v265_v21 = vld [vmem:[%s528_s4] ss:$0 sm:$0xff]  ;;  %p399_p10 = scmp.ne.s32.totalorder %s252_s8, %s398_s2  ;;  %p404_p12 = scmp.lt.s32.totalorder %s398_s2, %s398_s2 }
  0x3d   :  { %289 = vmatpush3.bf16.msra.mxu0 %v323_v2  ;;  %297 = vmatpush3.bf16.msra.mxu1 %v325_v6  ;;  %p405_p13 = por %p404_p12, %p403_p11 }
  0x3e   :  { %298 = vmatprep.subr.bf16.mxu1 %v431_v0 }
  0x3f   :  { %p406_p0 = pnand %p405_p13, %p399_p10 }
  0x40   :  { %291 = vmatmul.mubr.msk.bf16.vlgmr.msra.gmra.mrb[0].mxu0 %vm86_vm1, %v62_v5 }
  0x41   :  { %299 = vmatpush3.bf16.msra.mxu1 %v326_v7 }
  0x42   :  { %300 = vmatprep.subr.bf16.mxu1 %v431_v0 }
  0x45   :  { %301 = vmatpush3.bf16.msra.mxu1 %v327_v8 }
  0x46   :  { %302 = vmatprep.subr.bf16.mxu1 %v431_v0 }
  0x49   :  { %303 = vmatpush3.bf16.msra.mxu1 %v328_v9 }
  0x4a   :  { %304 = vmatprep.subr.bf16.mxu1 %v431_v0 }
  0x4d   :  { %305 = vmatpush3.bf16.msra.mxu1 %v329_v10 }
  0x4e   :  { %306 = vmatprep.subr.bf16.mxu1 %v431_v0 }
  0x51   :  { %307 = vmatpush3.bf16.msra.mxu1 %v330_v11 }
  0x52   :  { %308 = vmatprep.subr.bf16.mxu1 %v431_v0 }
  0x55   :  { %309 = vmatpush3.bf16.msra.mxu1 %v331_v12 }
 0x113   :  { %v124_v14 = vpop.f32.mrb[0].mxu0 }
 0x114   :  { %v125_v15 = vadd.f32 %v261_v13, %v124_v14  ;;  %v292_v16 = vpop.f32.mrb[1].mxu0 }
 0x115   :  { %v127_v17 = vpop.f32.mrb[2].mxu0 }
 0x116   :  { %v130_v18 = vmax.f32 %v125_v15, 0.0  ;;  %v293_v19 = vpop.f32.mrb[3].mxu0 }
 0x118   :  { %v131_v20 = vpack.c.bf16 %v130_v18, %v130_v18 }
 0x11a   :  { %311 = vmatmul.mubr.bf16.vlgmr.msra.gmra.mrb[0].mxu1 %v131_v20 }
 0x1ed   :  { %v237_v22 = vpop.f32.mrb[0].mxu1 }
 0x1ee   :  { %v238_v23 = vadd.f32 %v265_v21, %v237_v22  ;;  %v312_v24 = vpop.f32.mrb[1].mxu1 }
 0x1ef   :  { %v240_v25 = vpop.f32.mrb[2].mxu1 }
 0x1f0   :  { %v243_v26 = vpack.c.bf16 %v238_v23, %v238_v23  ;;  %v313_v27 = vpop.f32.mrb[3].mxu1 }
 0x1f2   :  { %244 = vst [vmem:[#allocation8] sm:$0xf] %v243_v26 }
 0x1f3   :  { %409 = shalt.err (!%p406_p0)
}
 0x1f4   :  { %s410_s4 = scalar_lea.hbm %s529_s5, 64 }
 0x1f5   :  { %p411_p1 = scmp.ne.s32.totalorder %s529_s5, %s410_s4  ;;  %p414_p2 = scmp.lt.u32.totalorder %s410_s4, %s529_s5 }
 0x1f7   :  { %p416_p3 = pnand %p414_p2, %p411_p1 }
 0x1f9   :  { %419 = shalt.err (!%p416_p3)
}
 0x1fa   :  { %254 = dma.vmem_to_hbm [thread:$0]  %s252_s8, 64, %s529_s5, [#allocation4]  }
 0x1fb   :  { %424 = dma.done.wait [#allocation4], 64  }
 0x1fc   :  { %425 = vsyncadd [#allocation4], 4294967232 }
 0x1fd   :  { %258 = vsyncpa [#allocation3], 1 }
 0x1fe   :  { %259 = vsyncpa [#allocation6], 1 }
 0x1ff   :  { %260 = vsyncpa [#allocation4], 1 }

</bundles_post_ra>
